<compile_context>
chip_gen: v7x
topology: tpu7x:2x2x1
jax: 0.10.0
libtpu: 0.0.40
codegen_flags: <defaults>
</compile_context>

<pallas_src>
import functools

import jax
import jax.numpy as jnp
from jax.experimental import pallas as pl
from jax.experimental.pallas import tpu as pltpu

# ----------------------------- configuration -----------------------------
NUM_TAGS = 8      # D = C = num_tags
CO = 50           # cnn_kernel_num
K = 3             # cnn_kernel_size = [3]
N, T = 2, 16      # batch, sequence length
# cnn_dp = 0  ->  nn.Dropout(0) is an exact identity (nothing to emulate)


# ----------------------------- Pallas kernel -----------------------------
def _cnn_kernel(x_ref, m_ref, w_ref, b_ref, o_ref, *, seq_len):
    """Fused: mask -> conv(kernel 3, 'same' over time) -> ReLU -> sum over Co.

    x_ref : (N*T, D)    activations, rows are (batch, time) flattened
    m_ref : (N*T, 1)    mask
    w_ref : (3*D, Co)   conv weight, rows ordered [t-1 taps | t taps | t+1 taps]
    b_ref : (1, Co)     conv bias
    o_ref : (N*T, 1)    sum_o relu(conv)[row, o]
    """
    xm = x_ref[...] * m_ref[...]                          # masked input (NT, D)
    nt, d = xm.shape

    # time index within each sequence (row r = n * seq_len + t)
    t_idx = jax.lax.broadcasted_iota(jnp.int32, (nt, d), 0) % seq_len

    # time-shifted copies with zero ("same") padding at sequence boundaries
    prev = pltpu.roll(xm, shift=1, axis=0)                # row r-1
    prev = jnp.where(t_idx == 0, 0.0, prev)
    nxt = pltpu.roll(xm, shift=nt - 1, axis=0)            # row r+1
    nxt = jnp.where(t_idx == seq_len - 1, 0.0, nxt)

    stacked = jnp.concatenate([prev, xm, nxt], axis=1)    # (NT, 3D)

    conv = (
        jnp.dot(stacked, w_ref[...], preferred_element_type=jnp.float32)
        + b_ref[...]
    )                                                     # (NT, Co)
    conv = jnp.maximum(conv, 0.0)                         # ReLU
    # TODO(synk): nn.Dropout(cnn_dp=0) is an exact identity at p=0; nothing to do.
    o_ref[...] = jnp.sum(conv, axis=1, keepdims=True)     # sum over channels


# ----------------------------- wrapper -----------------------------
def cnn_forward(x, mask, weight, bias):
    """JAX/Pallas equivalent of cnn.forward(x, mask).

    x      : (N, T, D) float32
    mask   : (N, T)    float32
    weight : (Co, 1, K, D) float32  (PyTorch Conv2d layout)
    bias   : (Co,)     float32
    returns (N, T) float32
    """
    n, t, d = x.shape
    co = weight.shape[0]

    # (Co, 1, K, D) -> (K*D, Co), tap-major so rows line up with the
    # [prev | cur | next] concatenation inside the kernel.
    w_stack = jnp.transpose(weight[:, 0, :, :], (1, 2, 0)).reshape(K * d, co)
    b_row = bias.reshape(1, co)

    out_flat = pl.pallas_call(
        functools.partial(_cnn_kernel, seq_len=t),
        out_shape=jax.ShapeDtypeStruct((n * t, 1), jnp.float32),
        in_specs=[pl.BlockSpec(memory_space=pltpu.MemorySpace.VMEM)] * 4,
        out_specs=pl.BlockSpec(memory_space=pltpu.MemorySpace.VMEM),
    )(x.reshape(n * t, d), mask.reshape(n * t, 1), w_stack, b_row)

    return out_flat.reshape(n, t)


# ----------------------------- pure-JAX reference -----------------------------
def cnn_forward_ref(x, mask, weight, bias):
    n, t, d = x.shape
    xm = x * mask[:, :, None]
    xp = jnp.pad(xm, ((0, 0), (1, 1), (0, 0)))            # 'same' pad over time
    w = weight[:, 0, :, :]                                # (Co, K, D)
    conv = bias[None, None, :] + sum(
        jnp.einsum(
            "ntd,od->nto",
            xp[:, k:k + t, :],
            w[:, k, :],
            precision=jax.lax.Precision.HIGHEST,
        )
        for k in range(K)
    )                                                     # (N, T, Co)
    return jax.nn.relu(conv).sum(-1)                      # (N, T)


# ----------------------------- main -----------------------------
if __name__ == "__main__":
    key = jax.random.PRNGKey(0)
    kx, kw, kb = jax.random.split(key, 3)

    x = jax.random.normal(kx, (N, T, NUM_TAGS), jnp.float32)
    seq_lens = jnp.array([T, T - 3], jnp.int32)
    mask = (jnp.arange(T)[None, :] < seq_lens[:, None]).astype(jnp.float32)

    fan_in = 1 * K * NUM_TAGS
    bound = 1.0 / (fan_in ** 0.5)
    weight = jax.random.uniform(kw, (CO, 1, K, NUM_TAGS), jnp.float32, -bound, bound)
    bias = jax.random.uniform(kb, (CO,), jnp.float32, -bound, bound)

    out = cnn_forward(x, mask, weight, bias)
    out = jax.block_until_ready(out)

    ref = cnn_forward_ref(x, mask, weight, bias)
    if not bool(jnp.allclose(out, ref, rtol=2e-2, atol=2e-2)):
        raise AssertionError(
            f"kernel/reference mismatch, max |diff| = {jnp.max(jnp.abs(out - ref))}"
        )
    print("KERNEL_OK")
</pallas_src>

<mosaic_0001>
module attributes {stable_mosaic.version = 11 : i64} {
  func.func @_cnn_kernel(%arg0: memref<32x8xf32, #tpu.memory_space<vmem>>, %arg1: memref<32x1xf32, #tpu.memory_space<vmem>>, %arg2: memref<24x50xf32, #tpu.memory_space<vmem>>, %arg3: memref<1x50xf32, #tpu.memory_space<vmem>>, %arg4: memref<32x1xf32, #tpu.memory_space<vmem>>) attributes {dimension_semantics = [], scalar_prefetch = 0 : i64, scratch_operands = 0 : i64, tpu.core_type = #tpu.core_type<tc>} {
    %c0 = arith.constant 0 : index
    %c0_0 = arith.constant 0 : index
    %0 = vector.load %arg0[%c0, %c0_0] : memref<32x8xf32, #tpu.memory_space<vmem>>, vector<32x8xf32>
    %c0_1 = arith.constant 0 : index
    %c0_2 = arith.constant 0 : index
    %1 = vector.load %arg1[%c0_1, %c0_2] : memref<32x1xf32, #tpu.memory_space<vmem>>, vector<32x1xf32>
    %2 = vector.broadcast %1 : vector<32x1xf32> to vector<32x8xf32>
    %3 = arith.mulf %0, %2 : vector<32x8xf32>
    %4 = tpu.iota {dimensions = array<i32: 0>} : vector<32x8xi32>
    %c16_i32 = arith.constant 16 : i32
    %c0_i32 = arith.constant 0 : i32
    %5 = arith.cmpi eq, %c16_i32, %c0_i32 : i32
    %c1_i32 = arith.constant 1 : i32
    %6 = arith.select %5, %c1_i32, %c16_i32 : i32
    %7 = vector.broadcast %6 : i32 to vector<32x8xi32>
    %8 = arith.remsi %4, %7 : vector<32x8xi32>
    %c0_i32_3 = arith.constant 0 : i32
    %9 = vector.broadcast %c0_i32_3 : i32 to vector<32x8xi32>
    %10 = arith.cmpi ne, %8, %9 : vector<32x8xi32>
    %c0_i32_4 = arith.constant 0 : i32
    %11 = vector.broadcast %c0_i32_4 : i32 to vector<32x8xi32>
    %12 = arith.cmpi slt, %8, %11 : vector<32x8xi32>
    %c0_i32_5 = arith.constant 0 : i32
    %13 = arith.cmpi slt, %6, %c0_i32_5 : i32
    %14 = vector.broadcast %13 : i1 to vector<32x8xi1>
    %15 = vector.broadcast %14 : vector<32x8xi1> to vector<32x8xi1>
    %16 = arith.xori %12, %15 : vector<32x8xi1>
    %17 = arith.andi %16, %10 : vector<32x8xi1>
    %18 = vector.broadcast %6 : i32 to vector<32x8xi32>
    %19 = arith.addi %8, %18 : vector<32x8xi32>
    %20 = arith.select %17, %19, %8 : vector<32x8xi1>, vector<32x8xi32>
    %c1_i32_6 = arith.constant 1 : i32
    %21 = tpu.dynamic_rotate %3 by %c1_i32_6 dim 0 : vector<32x8xf32>, i32 -> vector<32x8xf32>
    %c0_i32_7 = arith.constant 0 : i32
    %22 = vector.broadcast %c0_i32_7 : i32 to vector<32x8xi32>
    %23 = arith.cmpi eq, %20, %22 : vector<32x8xi32>
    %cst = arith.constant 0.000000e+00 : f32
    %24 = vector.broadcast %cst : f32 to vector<32x8xf32>
    %25 = arith.select %23, %24, %21 : vector<32x8xi1>, vector<32x8xf32>
    %c31_i32 = arith.constant 31 : i32
    %26 = tpu.dynamic_rotate %3 by %c31_i32 dim 0 : vector<32x8xf32>, i32 -> vector<32x8xf32>
    %c15_i32 = arith.constant 15 : i32
    %27 = vector.broadcast %c15_i32 : i32 to vector<32x8xi32>
    %28 = arith.cmpi eq, %20, %27 : vector<32x8xi32>
    %cst_8 = arith.constant 0.000000e+00 : f32
    %29 = vector.broadcast %cst_8 : f32 to vector<32x8xf32>
    %30 = arith.select %28, %29, %26 : vector<32x8xi1>, vector<32x8xf32>
    %31 = tpu.concatenate %25, %3, %30 in 1 : vector<32x8xf32>, vector<32x8xf32>, vector<32x8xf32> -> vector<32x24xf32>
    %c0_9 = arith.constant 0 : index
    %c0_10 = arith.constant 0 : index
    %32 = vector.load %arg2[%c0_9, %c0_10] : memref<24x50xf32, #tpu.memory_space<vmem>>, vector<24x50xf32>
    %cst_11 = arith.constant dense<0.000000e+00> : vector<32x50xf32>
    %33 = tpu.matmul %31, %32, %cst_11 {dimension_numbers = #tpu.dot_dimension_numbers<[1], [0], [0], [1], [0, 0, 1, 1], [], []>} : vector<32x24xf32>, vector<24x50xf32>, vector<32x50xf32> -> vector<32x50xf32>
    %c0_12 = arith.constant 0 : index
    %c0_13 = arith.constant 0 : index
    %34 = vector.load %arg3[%c0_12, %c0_13] : memref<1x50xf32, #tpu.memory_space<vmem>>, vector<1x50xf32>
    %35 = vector.broadcast %34 : vector<1x50xf32> to vector<32x50xf32>
    %36 = arith.addf %33, %35 : vector<32x50xf32>
    %cst_14 = arith.constant 0.000000e+00 : f32
    %37 = vector.broadcast %cst_14 : f32 to vector<32x50xf32>
    %38 = arith.maximumf %36, %37 : vector<32x50xf32>
    %cst_15 = arith.constant dense<0.000000e+00> : vector<32xf32>
    %39 = vector.multi_reduction <add>, %38, %cst_15 [1] : vector<32x50xf32> to vector<32xf32>
    %40 = vector.shape_cast %39 : vector<32xf32> to vector<32x1xf32>
    %c0_16 = arith.constant 0 : index
    %c0_17 = arith.constant 0 : index
    %41 = vector.load %arg4[%c0_16, %c0_17] : memref<32x1xf32, #tpu.memory_space<vmem>>, vector<32x1xf32>
    tpu.vector_store %arg4[%c0_16, %c0_17], %40 {strides = array<i32>} : memref<32x1xf32, #tpu.memory_space<vmem>>, vector<32x1xf32>,
    return
  }
}

</mosaic_0001>

<bundles_post_ra>
// kernel: tpu_custom_call.1
= control target key start
LH: loop header
LB: loop body
LE: loop exit
PB: predicated region body
PF: predicated region fallthrough
CT: control target
= control target key end

     0   :  { %v349_v0 = vmov 0   ;;  %v49_v5 = vlaneseq  ;;  %vm168_vm6 = vcmask 64512   ;;  %vm173_vm7 = vcmask 130048   ;;  %s465_s1 = inlined_call_operand.vmem [shape: f32[32,1], index: 1, kind: input, shape index: {}]   ;;  %s466_s2 = inlined_call_operand.vmem [shape: f32[24,50], index: 2, kind: input, shape index: {}]   ;;  %s467_s0 = inlined_call_operand.vmem [shape: f32[32,8], index: 0, kind: input, shape index: {}]   ;;  %s468_s3 = inlined_call_operand.vmem [shape: f32[1,50], index: 3, kind: input, shape index: {}]   ;;  %s469_s4 = inlined_call_operand.vmem [shape: f32[32,1], index: 4, kind: output, shape index: {}]  }
   0x1   :  { %348 = vset.pattern.permute.xlu1 %v349_v0  ;;  %347 = vset.pattern.permute.xlu0 %v349_v0  ;;  %v23_v1 = vld [vmem:[%s465_s1 + $0x10] sm:$0xff]  ;;  %v21_v2 = vld [vmem:[%s465_s1] sm:$0xff]  ;;  %v24_v3 = vld [vmem:[%s465_s1 + $0x18] sm:$0xff]  ;;  %vm188_vm8 = vcmask 195584   ;;  %vm290_vm9 = vcmask 408576   ;;  %vm303_vm10 = vcmask 7168  }
   0x2   :  { %37 = vperm.xlu1 %348, %v23_v1   ;;  %27 = vperm.xlu0 %347, %v21_v2   ;;  %v22_v4 = vld [vmem:[%s465_s1 + $0x8] sm:$0xff]  ;;  %v178_v6 = vld [vmem:[%s466_s2] sm:$0xff]  ;;  %v395_v8 = vshrl.u32 %v49_v5, 7  ;;  %v19_v10 = vld [vmem:[%s467_s0 + $0x10] sm:$0xff] }
   0x3   :  { %v179_v7 = vld [vmem:[%s466_s2 + $0x8] sm:$0xff]  ;;  %v17_v11 = vld [vmem:[%s467_s0] sm:$0xff]  ;;  %v180_v12 = vld [vmem:[%s466_s2 + $0x10] sm:$0xff]  ;;  %s350_s2 = smov 8  }
   0x4   :  { %v336_v9 = vpack.c.bf16 %v179_v7, %v178_v6  ;;  %v53_v15 = vadd.s32 24, %v395_v8  ;;  %v52_v16 = vadd.s32 16, %v395_v8  ;;  %v51_v19 = vadd.s32 8, %v395_v8  ;;  %v20_v20 = vld [vmem:[%s467_s0 + $0x18] sm:$0xff]  ;;  %v18_v21 = vld [vmem:[%s467_s0 + $0x8] sm:$0xff]  ;;  %s351_s0 = smov 16  }
   0x5   :  { %v58_v26 = vand.u32 15, %v395_v8  ;;  %vm123_vm0 = vcmp.lt.s32.totalorder %v395_v8, 7  ;;  %vm106_vm1 = vcmp.lt.s32.totalorder %v395_v8, 1 }
   0x6   :  { %42 = vperm.xlu1 %348, %v24_v3   ;;  %32 = vperm.xlu0 %347, %v22_v4   ;;  %v79_v24 = vand.u32 15, %v53_v15  ;;  %v72_v25 = vand.u32 15, %v52_v16  ;;  %v65_v30 = vand.u32 15, %v51_v19  ;;  %v312_v4 = vld [vmem:[%s468_s3] ss:$0 sm:$0xff] }
   0x7   :  { %337 = vmatprep.subr.bf16.mxu0 %v336_v9  ;;  %340 = vmatprep.subr.bf16.mxu1 %v336_v9  ;;  %vm422_vm3 = vcmp.eq.s32.totalorder %v58_v26, 0 }
   0x8   :  { %339 = vmatpush3.bf16.msra.mxu0 %v336_v9  ;;  %342 = vmatpush3.bf16.msra.mxu1 %v336_v9  ;;  %vm418_vm2 = vcmp.eq.s32.totalorder %v72_v25, 0  ;;  %vm131_vm4 = vcmp.eq.s32.totalorder %v79_v24, 15  ;;  %vm129_vm5 = vcmp.eq.s32.totalorder %v65_v30, 15 }
   0x9   :  { %328 = vmatprep.subr.mxu0 %v180_v12  ;;  %341 = vmatprep.subr.mxu1 %v180_v12 }
   0xc   :  { %329 = vmatpush3.msra.mxu0 %v180_v12  ;;  %343 = vmatpush3.msra.mxu1 %v180_v12 }
  0x81   :  { %v38_v13 = vpop.permute.xlu1 %37  ;;  %v28_v14 = vpop.permute.xlu0 %27 }
  0x82   :  { %v47_v17 = vmul.f32 %v38_v13, %v19_v10  ;;  %v45_v18 = vmul.f32 %v28_v14, %v17_v11 }
  0x84   :  { %144 = vrot.lane.b32.xlu1 %v47_v17, %s350_s2  ;;  %140 = vrot.lane.b32.xlu0 %v45_v18, %s350_s2  ;;  %v121_v27 = vrot.slane %v47_v17, 1  ;;  %v104_v31 = vrot.slane %v47_v17, 7  ;;  %v119_v32 = vrot.slane %v45_v18, 1  ;;  %v102_v37 = vrot.slane %v45_v18, 7 }
  0x85   :  { %v43_v22 = vpop.permute.xlu1 %42  ;;  %v33_v23 = vpop.permute.xlu0 %32 }
  0x86   :  { %v48_v28 = vmul.f32 %v43_v22, %v20_v20  ;;  %v46_v29 = vmul.f32 %v33_v23, %v18_v21 }
  0x88   :  { %v105_v33 = vrot.slane %v48_v28, 7  ;;  %v122_v34 = vrot.slane %v48_v28, 1  ;;  %v103_v35 = vrot.slane %v46_v29, 7  ;;  %v120_v36 = vrot.slane %v46_v29, 1  ;;  %146 = vrot.lane.b32.xlu1 %v48_v28, %s350_s2  ;;  %142 = vrot.lane.b32.xlu0 %v46_v29, %s350_s2 }
  0x8a   :  { %v124_v40 = vsel %vm123_vm0, %v121_v27, %v122_v34  ;;  %v126_v41 = vsel %vm123_vm0, %v119_v32, %v120_v36  ;;  %v127_v42 = vsel %vm123_vm0, %v122_v34, %v119_v32  ;;  %v125_v43 = vsel %vm123_vm0, %v120_v36, %v121_v27 }
  0x8b   :  { %v108_v44 = vsel %vm106_vm1, %v103_v35, %v104_v31  ;;  %v110_v45 = vsel %vm106_vm1, %v105_v33, %v102_v37  ;;  %v107_v48 = vsel %vm106_vm1, %v104_v31, %v105_v33  ;;  %v109_v49 = vsel %vm106_vm1, %v102_v37, %v103_v35 }
  0x8c   :  { %160 = vrot.lane.b32.xlu1 %v124_v40, %s351_s0  ;;  %156 = vrot.lane.b32.xlu0 %v126_v41, %s351_s0  ;;  %v117_v46 = vsel %vm418_vm2, 0.0, %v108_v44  ;;  %v115_v47 = vsel %vm422_vm3, 0.0, %v110_v45  ;;  %v135_v50 = vsel %vm131_vm4, 0.0, %v127_v42  ;;  %v133_v51 = vsel %vm129_vm5, 0.0, %v125_v43 }
  0x90   :  { %162 = vrot.lane.b32.xlu1 %v135_v50, %s351_s0  ;;  %158 = vrot.lane.b32.xlu0 %v133_v51, %s351_s0 }
  0xf6   :  { %v145_v52 = vpop.permute.xlu1 %144  ;;  %v141_v53 = vpop.permute.xlu0 %140 }
  0xf7   :  { %v171_v56 = vsel %vm168_vm6, %v117_v46, %v145_v52  ;;  %v169_v57 = vsel %vm168_vm6, %v115_v47, %v141_v53 }
  0xfa   :  { %v147_v54 = vpop.permute.xlu1 %146  ;;  %v143_v55 = vpop.permute.xlu0 %142 }
  0xfb   :  { %v172_v62 = vsel %vm168_vm6, %v107_v48, %v147_v54  ;;  %v170_v63 = vsel %vm168_vm6, %v109_v49, %v143_v55 }
  0xfe   :  { %v161_v58 = vpop.permute.xlu1 %160  ;;  %v157_v59 = vpop.permute.xlu0 %156 }
  0xff   :  { %v174_v60 = vsel %vm173_vm7, %v169_v57, %v157_v59  ;;  %v176_v61 = vsel %vm173_vm7, %v171_v56, %v161_v58 }
 0x100   :  { %330 = vmatprep.mubr.msk.f32.mxu0 %vm188_vm8, %v174_v60  ;;  %333 = vmatprep.mubr.msk.f32.mxu1 %vm188_vm8, %v176_v61 }
 0x102   :  { %v163_v0 = vpop.permute.xlu1 %162  ;;  %v159_v1 = vpop.permute.xlu0 %158 }
 0x103   :  { %v177_v2 = vsel %vm173_vm7, %v172_v62, %v163_v0  ;;  %v175_v3 = vsel %vm173_vm7, %v170_v63, %v159_v1 }
 0x104   :  { %331 = vmatmul.mubr.msk.f32.vlgmr.msra.gmra.mrb[0].mxu0 %vm188_vm8, %v175_v3  ;;  %334 = vmatmul.mubr.msk.f32.vlgmr.msra.gmra.mrb[0].mxu1 %vm188_vm8, %v177_v2 }
 0x1d7   :  { %v332_v5 = vpop.f32.mrb[0].mxu0  ;;  %v335_v6 = vpop.f32.mrb[0].mxu1 }
 0x1d8   :  { %v273_v7 = vadd.f32 %v332_v5, %v312_v4  ;;  %v267_v8 = vpop.f32.mrb[1].mxu0  ;;  %v277_v9 = vpop.f32.mrb[1].mxu1  ;;  %v283_v15 = vadd.f32 %v335_v6, %v312_v4 }
 0x1d9   :  { %v268_v10 = vadd.f32 %v312_v4, %v267_v8  ;;  %v278_v11 = vadd.f32 %v312_v4, %v277_v9 }
 0x1da   :  { %v287_v12 = vmax.f32 %v273_v7, 0.0  ;;  %v289_v18 = vmax.f32 %v283_v15, 0.0 }
 0x1db   :  { %v286_v13 = vmax.f32 %v268_v10, 0.0  ;;  %v288_v16 = vmax.f32 %v278_v11, 0.0 }
 0x1dc   :  { %v294_v14 = vsel %vm290_vm9, %v287_v12, 0.0  ;;  %v300_v20 = vsel %vm290_vm9, %v289_v18, 0.0 }
 0x1dd   :  { %295 = vadd.xlane.f32.xlu1 %v294_v14  ;;  %v291_v17 = vsel %vm290_vm9, %v286_v13, 0.0  ;;  %v297_v19 = vsel %vm290_vm9, %v288_v16, 0.0 }
 0x1de   :  { %292 = vadd.xlane.f32.xlu0 %v291_v17 }
 0x1e2   :  { %298 = vadd.xlane.f32.xlu0 %v297_v19 }
 0x1e6   :  { %301 = vadd.xlane.f32.xlu0 %v300_v20 }
 0x26a   :  { %v296_v21 = vpop.xlane.xlu1 %295 }
 0x26b   :  { %305 = vst.msk [vmem:[%s469_s4 + $0x8] sm:$0xff] %vm303_vm10, %v296_v21  ;;  %v293_v22 = vpop.xlane.xlu0 %292 }
 0x26c   :  { %304 = vst.msk [vmem:[%s469_s4] sm:$0xff] %vm303_vm10, %v293_v22 }
 0x26f   :  { %v299_v23 = vpop.xlane.xlu0 %298 }
 0x270   :  { %306 = vst.msk [vmem:[%s469_s4 + $0x10] sm:$0xff] %vm303_vm10, %v299_v23 }
 0x273   :  { %v302_v24 = vpop.xlane.xlu0 %301 }
 0x274   :  { %307 = vst.msk [vmem:[%s469_s4 + $0x18] sm:$0xff] %vm303_vm10, %v302_v24 }

</bundles_post_ra>
